<compile_context>
chip_gen: v7x
topology: tpu7x:2x2x1
jax: 0.10.0
libtpu: 0.0.40
codegen_flags: <defaults>
</compile_context>

<pallas_src>
import functools

import jax
import jax.numpy as jnp
from jax.experimental import pallas as pl
from jax.experimental.pallas import tpu as pltpu


def _adapter_kernel(x_ref, w1t_ref, w2t_ref, o_ref, *, compute_dtype):
    # x_ref  : (TB, c_in)     streamed in the caller's native dtype
    # w1t_ref: (c_in, hidden) = fc[0].weight.T, resident in VMEM (constant index_map)
    # w2t_ref: (hidden, c_in) = fc[2].weight.T, resident in VMEM (constant index_map)
    # o_ref  : (TB, c_in)     streamed out (bf16 by default)
    x = x_ref[...].astype(compute_dtype)            # cast in-kernel: no extra HBM pass

    h = jnp.dot(x, w1t_ref[...],
                preferred_element_type=jnp.float32)  # (TB, hidden), f32 accumulate
    h = jnp.maximum(h, 0.0)                          # ReLU in f32

    y = jnp.dot(h.astype(compute_dtype), w2t_ref[...],
                preferred_element_type=jnp.float32)  # (TB, c_in), f32 accumulate
    y = jnp.maximum(y, 0.0)                          # ReLU in f32

    o_ref[...] = y.astype(o_ref.dtype)


def _round_up(n, m):
    return ((n + m - 1) // m) * m


def adapter_forward(x, w1, w2, *, block_b=512,
                    compute_dtype=jnp.bfloat16, out_dtype=jnp.bfloat16):
    """Adapter forward: relu(relu(x @ w1.T) @ w2.T).

    x : (B, c_in)        activations (any float dtype; streamed as-is)
    w1: (hidden, c_in)   = fc[0].weight  (PyTorch (out, in) layout)
    w2: (c_in, hidden)   = fc[2].weight  (PyTorch (out, in) layout)

    compute_dtype: matmul operand dtype (bf16 default; float32 for bit-closeness).
    out_dtype    : output dtype (bf16 default; None -> x.dtype).
    """
    B, c_in = x.shape
    hidden, c_in_w1 = w1.shape
    assert c_in_w1 == c_in and w2.shape == (c_in, hidden)

    out_dtype = x.dtype if out_dtype is None else out_dtype

    # One-time HBM-side transpose + cast of the tiny weights (negligible vs the
    # activation stream); avoids contract-on-RHS-last-dim transposes in-kernel.
    w1t = w1.T.astype(compute_dtype)   # (c_in, hidden)
    w2t = w2.T.astype(compute_dtype)   # (hidden, c_in)

    # Batch tile: multiple of 16 rows (sublane rule for f32/bf16 tiles) and
    # capped at ~B/2 so there are always >= 2 grid steps (both v7x TCs used).
    if B > 16:
        tb = min(block_b, _round_up(pl.cdiv(B, 2), 16))
    else:
        tb = _round_up(B, 8)
    grid = (pl.cdiv(B, tb),)

    x_item = jnp.dtype(x.dtype).itemsize
    o_item = jnp.dtype(out_dtype).itemsize
    w_item = jnp.dtype(compute_dtype).itemsize

    cost = pl.CostEstimate(
        flops=2 * B * c_in * hidden * 2,                    # two matmuls
        transcendentals=0,
        bytes_accessed=(B * c_in * x_item                   # read x (native dtype)
                        + B * c_in * o_item                 # write y (bf16)
                        + 2 * hidden * c_in * w_item),      # weights fetched once
    )

    # VMEM plan: double-buffered x / out tiles + (double-buffered) weights +
    # f32 intermediates. Generous headroom, but clamped well under v7x's
    # 64 MiB physical VMEM; also explicitly exceeds v5e's 16 MiB default limit.
    plan_bytes = (2 * tb * c_in * x_item
                  + 2 * tb * c_in * o_item
                  + 2 * 2 * hidden * c_in * w_item
                  + tb * (hidden + c_in) * 4)
    vmem_limit = int(min(max(2 * plan_bytes, 32 * 1024 * 1024), 56 * 1024 * 1024))

    kernel = functools.partial(_adapter_kernel, compute_dtype=compute_dtype)

    return pl.pallas_call(
        kernel,
        out_shape=jax.ShapeDtypeStruct((B, c_in), out_dtype),
        grid_spec=pltpu.PrefetchScalarGridSpec(
            num_scalar_prefetch=0,
            grid=grid,
            in_specs=[
                pl.BlockSpec((tb, c_in), lambda i: (i, 0)),       # stream x tiles
                pl.BlockSpec((c_in, hidden), lambda i: (0, 0)),   # W1^T resident
                pl.BlockSpec((hidden, c_in), lambda i: (0, 0)),   # W2^T resident
            ],
            out_specs=pl.BlockSpec((tb, c_in), lambda i: (i, 0)), # stream y tiles
        ),
        compiler_params=pltpu.CompilerParams(
            dimension_semantics=("parallel",),   # batch tiles independent
            vmem_limit_bytes=vmem_limit,
        ),
        cost_estimate=cost,
    )(x, w1t, w2t)


if __name__ == "__main__":
    # Shapes consistent with the module: c_in divisible by scale_down; batch
    # large enough that tb = round_up(cdiv(256,2),16) = 128 -> grid=(2,), which
    # exercises the streaming pipeline and the 2-TensorCore path on v7x.
    B = 256
    c_in = 512
    scale_down = 4
    hidden = c_in // scale_down  # 128

    key = jax.random.PRNGKey(0)
    kx, k1, k2 = jax.random.split(key, 3)

    # Deterministic synthetic parameters (PyTorch Linear weight layout: (out, in)).
    x = jax.random.normal(kx, (B, c_in), dtype=jnp.float32)
    w1 = jax.random.normal(k1, (hidden, c_in), dtype=jnp.float32) * (1.0 / jnp.sqrt(c_in))
    w2 = jax.random.normal(k2, (c_in, hidden), dtype=jnp.float32) * (1.0 / jnp.sqrt(hidden))

    y = adapter_forward(x, w1, w2)
    y = jax.block_until_ready(y)

    # Reference in plain f32 JAX (same semantics as the PyTorch module).
    # Tolerances are loose because the kernel uses bf16 operands / bf16 output
    # with f32 accumulation (mixed precision), not a bit-exact f32 matmul.
    ref = jnp.maximum(jnp.maximum(x @ w1.T, 0.0) @ w2.T, 0.0)
    assert y.shape == (B, c_in)
    assert y.dtype == jnp.bfloat16
    y_f32 = y.astype(jnp.float32)
    max_err = jnp.max(jnp.abs(y_f32 - ref))
    assert jnp.allclose(y_f32, ref, atol=2.5e-1, rtol=5e-2), f"max abs err = {max_err}"

    print("KERNEL_OK")
</pallas_src>

<mosaic_0001>
module attributes {stable_mosaic.version = 11 : i64} {
  func.func @_adapter_kernel(%arg0: i32, %arg1: memref<128x512xf32, #tpu.memory_space<vmem>>, %arg2: memref<512x128xbf16, #tpu.memory_space<vmem>>, %arg3: memref<128x512xbf16, #tpu.memory_space<vmem>>, %arg4: memref<128x512xbf16, #tpu.memory_space<vmem>>) attributes {dimension_semantics = [#tpu.dimension_semantics<parallel>], iteration_bounds = array<i64: 2>, scalar_prefetch = 0 : i64, scratch_operands = 0 : i64, tpu.core_type = #tpu.core_type<tc>, window_params = [{transform_indices = @transform_0, window_bounds = array<i64: 128, 512>}, {pipeline_mode = #tpu.pipeline_mode<synchronous>, transform_indices = @transform_1, window_bounds = array<i64: 512, 128>}, {pipeline_mode = #tpu.pipeline_mode<synchronous>, transform_indices = @transform_2, window_bounds = array<i64: 128, 512>}, {transform_indices = @transform_3, window_bounds = array<i64: 128, 512>}]} {
    %c0 = arith.constant 0 : index
    %c0_0 = arith.constant 0 : index
    %0 = vector.load %arg1[%c0, %c0_0] : memref<128x512xf32, #tpu.memory_space<vmem>>, vector<128x512xf32>
    %1 = arith.truncf %0 : vector<128x512xf32> to vector<128x512xbf16>
    %c0_1 = arith.constant 0 : index
    %c0_2 = arith.constant 0 : index
    %2 = vector.load %arg2[%c0_1, %c0_2] : memref<512x128xbf16, #tpu.memory_space<vmem>>, vector<512x128xbf16>
    %cst = arith.constant dense<0.000000e+00> : vector<128x128xf32>
    %3 = tpu.matmul %1, %2, %cst {dimension_numbers = #tpu.dot_dimension_numbers<[1], [0], [0], [1], [0, 0, 1, 1], [], []>} : vector<128x512xbf16>, vector<512x128xbf16>, vector<128x128xf32> -> vector<128x128xf32>
    %cst_3 = arith.constant 0.000000e+00 : f32
    %4 = vector.broadcast %cst_3 : f32 to vector<128x128xf32>
    %5 = arith.maximumf %3, %4 : vector<128x128xf32>
    %6 = arith.truncf %5 : vector<128x128xf32> to vector<128x128xbf16>
    %c0_4 = arith.constant 0 : index
    %c0_5 = arith.constant 0 : index
    %7 = vector.load %arg3[%c0_4, %c0_5] : memref<128x512xbf16, #tpu.memory_space<vmem>>, vector<128x512xbf16>
    %cst_6 = arith.constant dense<0.000000e+00> : vector<128x512xf32>
    %8 = tpu.matmul %6, %7, %cst_6 {dimension_numbers = #tpu.dot_dimension_numbers<[1], [0], [0], [1], [0, 0, 1, 1], [], []>} : vector<128x128xbf16>, vector<128x512xbf16>, vector<128x512xf32> -> vector<128x512xf32>
    %cst_7 = arith.constant 0.000000e+00 : f32
    %9 = vector.broadcast %cst_7 : f32 to vector<128x512xf32>
    %10 = arith.maximumf %8, %9 : vector<128x512xf32>
    %11 = arith.truncf %10 : vector<128x512xf32> to vector<128x512xbf16>
    %c0_8 = arith.constant 0 : index
    %c0_9 = arith.constant 0 : index
    %12 = vector.load %arg4[%c0_8, %c0_9] : memref<128x512xbf16, #tpu.memory_space<vmem>>, vector<128x512xbf16>
    tpu.vector_store %arg4[%c0_8, %c0_9], %11 {strides = array<i32>} : memref<128x512xbf16, #tpu.memory_space<vmem>>, vector<128x512xbf16>,
    return
  }
  func.func @transform_0(%arg0: i32) -> (i32, i32) {
    %c0_i32 = arith.constant 0 : i32
    %c0_i32_0 = arith.constant 0 : i32
    return %arg0, %c0_i32 : i32, i32
  }
  func.func @transform_1(%arg0: i32) -> (i32, i32) {
    %c0_i32 = arith.constant 0 : i32
    %c0_i32_0 = arith.constant 0 : i32
    %c0_i32_1 = arith.constant 0 : i32
    return %c0_i32, %c0_i32_0 : i32, i32
  }
  func.func @transform_2(%arg0: i32) -> (i32, i32) {
    %c0_i32 = arith.constant 0 : i32
    %c0_i32_0 = arith.constant 0 : i32
    %c0_i32_1 = arith.constant 0 : i32
    return %c0_i32, %c0_i32_0 : i32, i32
  }
  func.func @transform_3(%arg0: i32) -> (i32, i32) {
    %c0_i32 = arith.constant 0 : i32
    %c0_i32_0 = arith.constant 0 : i32
    return %arg0, %c0_i32 : i32, i32
  }
}

</mosaic_0001>

<bundles_post_ra>
// kernel: tpu_custom_call.1
= control target key start
LH: loop header
LB: loop body
LE: loop exit
PB: predicated region body
PF: predicated region fallthrough
CT: control target
= control target key end

     0   :  { %8 = vsyncpa [#allocation3], 0  ;;  %s2584_s0 = inlined_call_operand.hbm [shape: f32[256,512], index: 0, kind: input, shape index: {}]   ;;  %s2585_s1 = inlined_call_operand.hbm [shape: bf16[512,128], index: 1, kind: input, shape index: {}]   ;;  %s2586_s2 = inlined_call_operand.hbm [shape: bf16[128,512], index: 2, kind: input, shape index: {}]   ;;  %s2587_s3 = inlined_call_operand.hbm [shape: bf16[256,512], index: 3, kind: output, shape index: {}]  }
   0x1   :  { %10 = vsyncpa [#allocation3 + $0x1], 0 }
   0x2   :  { %11 = vsyncpa [#allocation6], 0 }
   0x3   :  { %12 = vsyncpa [#allocation4], 0 }
   0x4   :  { %14 = vsyncpa [#allocation4 + $0x1], 0  ;;  %s2232_s12 = smov 0   ;;  %s2234_s13 = smov 0  }
   0x5   :  { %s2236_s14 = smov 0   ;;  %s2238_s15 = smov 0  }
   0x6 LB: > { %s2253_s16 = sadd.s32 4294967295, %s2197_s15   ;;  %s1605_s17 = sadd.s32 4294967294, %s2197_s15   ;;  %s2197_s15 = sphi %s2238_s15, %s2607_s15   ;;  %s2193_s14 = sphi %s2236_s14, %s2606_s14   ;;  %s2189_s13 = sphi %s2234_s13, %s2605_s13   ;;  %s2185_s12 = sphi %s2232_s12, %s2604_s12  }
   0x7   : > { %p40_p0 = scmp.ne.s32.totalorder %s2189_s13, %s2185_s12  ;;  %p2588_p1 = scmp.eq.s32.totalorder %s2253_s16, 0 }
   0x8   : > { %p112_p3 = scmp.eq.s32.totalorder %s1605_s17, 1  ;;  %p1606_p5 = scmp.ge.s32.totalorder %s2197_s15, 1 }
   0x9   : > { %p2262_p4 = por %p2588_p1, %p40_p0  ;;  %p119_p7 = scmp.lt.s32.totalorder %s2197_s15, 3 }
   0xa   : > { %p2267_p6 = por %p112_p3, %p40_p0  ;;  %s2199_s21 = smov [#allocation5]  }
   0xb   : > { %s2591_s18 = scalar_select %p2262_p4, 1, 0 }
   0xc   : > { %s2592_s19 = scalar_select %p2267_p6, 1, 0 }
   0xd   : > { %p2272_p8 = pnand %p1606_p5, %p119_p7  ;;  %s131_s22 = sshll.u32 %s2199_s21, 4  ;;  %s2276_s22 = int_to_ptr.vmem [resolvable:$true] %s131_s22 }
   0xe   : > { %s2200_s24 = smov [#allocation7]   ;;  %s2041_s28 = scalar_lea.hbm %s2585_s1, 4096 }
   0xf   : > { %p1897_p9 = pneg %p2272_p8  ;;  %s144_s25 = sshll.u32 %s2200_s24, 4  ;;  %s2287_s25 = int_to_ptr.vmem [resolvable:$true] %s144_s25 }
  0x10   : > { %p2042_p12 = scmp.ne.s32.totalorder %s2585_s1, %s2041_s28  ;;  %p2048_p5 = scmp.lt.u32.totalorder %s2041_s28, %s2585_s1 }
  0x11   : > { %p2283_p11 = pnand %p1897_p9, %p2588_p1 }
  0x13   : > { %p2043_p13 = pneg %p2283_p11 }
  0x15   : > { %p2044_p0 = pnand %p2043_p13, %p2042_p12 }
  0x17   : > { %p2045_p3 = pneg %p2044_p0 }
  0x19   : > { %p2050_p7 = pnand %p2048_p5, %p2045_p3 }
  0x1b   : > { %2053 = shalt.err (!%p2050_p7)
}
  0x1c   : > { %s2054_s6 = scalar_lea.vmem %s2276_s22, 4096  ;;  %p2062_p2 = scmp.lt.s32.totalorder %s2276_s22, %s2276_s22 }
  0x1d   : > { %p2055_p9 = scmp.ne.s32.totalorder %s2276_s22, %s2054_s6  ;;  %p2063_p12 = scmp.lt.s32.totalorder %s2054_s6, %s2054_s6 }
  0x1f   : > { %p2057_p10 = pnand %p2055_p9, %p2043_p13  ;;  %p2064_p0 = por %p2063_p12, %p2062_p2 }
  0x21   : > { %p2058_p1 = pneg %p2057_p10 }
  0x23   : > { %p2065_p6 = pnand %p2064_p0, %p2058_p1 }
  0x25   : > { %2068 = shalt.err (!%p2065_p6)
}
  0x26   : > { %s2201_s7 = smov 64   ;;  %s2202_s8 = smov 4  }
  0x27   : > { %1900 = dma.hbm_to_vmem [thread:$0]  (!%p2283_p11), %s2585_s1, 4096, %s2276_s22, [#allocation6], %s2201_s7, %s2201_s7, %s2202_s8  }
  0x28   : > { %s2069_s21 = scalar_lea.hbm %s2586_s2, 4096 }
  0x29   : > { %p2070_p2 = scmp.ne.s32.totalorder %s2586_s2, %s2069_s21  ;;  %p2076_p10 = scmp.lt.u32.totalorder %s2069_s21, %s2586_s2 }
  0x2b   : > { %p2072_p1 = pnand %p2070_p2, %p2043_p13 }
  0x2d   : > { %p2073_p6 = pneg %p2072_p1 }
  0x2f   : > { %p2078_p3 = pnand %p2076_p10, %p2073_p6 }
  0x31   : > { %2081 = shalt.err (!%p2078_p3)
}
  0x32   : > { %s2082_s22 = scalar_lea.vmem %s2287_s25, 4096  ;;  %p2090_p12 = scmp.lt.s32.totalorder %s2287_s25, %s2287_s25 }
  0x33   : > { %p2083_p5 = scmp.ne.s32.totalorder %s2287_s25, %s2082_s22  ;;  %p2091_p0 = scmp.lt.s32.totalorder %s2082_s22, %s2082_s22 }
  0x35   : > { %p2085_p7 = pnand %p2083_p5, %p2043_p13  ;;  %p2092_p2 = por %p2091_p0, %p2090_p12 }
  0x37   : > { %p2086_p9 = pneg %p2085_p7 }
  0x39   : > { %p2093_p1 = pnand %p2092_p2, %p2086_p9 }
  0x3b   : > { %2096 = shalt.err (!%p2093_p1)
}
  0x3c   : > { %s2203_s29 = smov 256   ;;  %s2204_s30 = smov 16  }
  0x3d   : > { %1903 = dma.hbm_to_vmem [thread:$0]  (!%p2283_p11), %s2586_s2, 4096, %s2287_s25, [#allocation6], %s2203_s29, %s2203_s29, %s2204_s30  }
  0x3e   : > { %s2342_s6 = sadd.s32 1, %s2197_s15   ;;  %s27_s8 = sadd.s32 1, %s2193_s14 }
  0x3f   : > { %s24_s7 = ssub.s32 %s2197_s15, %s2342_s6  ;;  %p34_p6 = scmp.ne.s32.totalorder %s2193_s14, %s2189_s13 }
  0x40   : > { %p25_p13 = scmp.eq.s32.totalorder %s24_s7, 0  ;;  %p35_p10 = scmp.eq.s32.totalorder %s2197_s15, 0 }
  0x41   : > { %p2595_p5 = scmp.eq.s32.totalorder %s2253_s16, 1  ;;  %p1914_p9 = scmp.lt.s32.totalorder %s2197_s15, 2 }
  0x42   : > { %s2351_s9 = scalar_select %p25_p13, %s2193_s14, %s27_s8  }
  0x43   : > { %p36_p3 = por %p35_p10, %p34_p6  ;;  %p2355_p7 = por %p2595_p5, %p34_p6 }
  0x44   : > { %s158_s23 = sand.u32 1, %s2193_s14   ;;  %s1722_s25 = sshll.u32 %s2197_s15, 13 }
  0x45   : > { %s2596_s10 = scalar_select %p2355_p7, 1, 0 }
  0x46   : > { %s1610_s11 = sshll.u32 %s158_s23, 9  ;;  %s2365_s24 = scalar_lea.hbm %s2584_s0, %s1722_s25 }
  0x47   : > { %s162_s26 = scalar_lea.vmem [#allocation2], %s1610_s11  ;;  %p2369_p11 = pnand %p1914_p9, %p36_p3 }
  0x48   : > { %s170_s27 = sshll.u32 %s162_s26, 4  ;;  %s2373_s22 = scalar_lea.sflag [#allocation3], %s158_s23  ;;  %s2367_s27 = int_to_ptr.vmem [resolvable:$true] %s170_s27 }
  0x49   : > { %s2097_s29 = scalar_lea.hbm %s2365_s24, 8192  ;;  %p2099_p0 = pneg %p2369_p11 }
  0x4a   : > { %p2098_p12 = scmp.ne.s32.totalorder %s2365_s24, %s2097_s29  ;;  %s2102_s5 = scalar_lea.hbm %s2584_s0, 16384 }
  0x4b   : > { %p2103_p13 = scmp.lt.u32.totalorder %s2365_s24, %s2584_s0  ;;  %p2104_p6 = scmp.lt.u32.totalorder %s2102_s5, %s2097_s29 }
  0x4c   : > { %p2100_p2 = pnand %p2099_p0, %p2098_p12  ;;  %p2106_p3 = scmp.lt.u32.totalorder %s2097_s29, %s2365_s24 }
  0x4d   : > { %p2105_p10 = por %p2104_p6, %p2103_p13 }
  0x4e   : > { %p2101_p1 = pneg %p2100_p2 }
  0x4f   : > { %p2107_p5 = por %p2106_p3, %p2105_p10 }
  0x51   : > { %p2108_p9 = pnand %p2107_p5, %p2101_p1 }
  0x53   : > { %2111 = shalt.err (!%p2108_p9)
}
  0x54   : > { %s2112_s23 = scalar_lea.vmem %s2367_s27, 8192  ;;  %s2205_s11 = smov [#allocation2]  }
  0x55   : > { %p2113_p12 = scmp.ne.s32.totalorder %s2367_s27, %s2112_s23  ;;  %s2117_s25 = sshll.u32 %s2205_s11, 4  ;;  %s2118_s25 = int_to_ptr.vmem [resolvable:$false] %s2117_s25 }
  0x56   : > { %s2119_s17 = scalar_lea.vmem %s2118_s25, 16384  ;;  %p2120_p4 = scmp.lt.s32.totalorder %s2367_s27, %s2118_s25 }
  0x57   : > { %p2115_p2 = pnand %p2113_p12, %p2099_p0  ;;  %p2121_p13 = scmp.lt.s32.totalorder %s2119_s17, %s2112_s23 }
  0x59   : > { %p2116_p7 = pneg %p2115_p2  ;;  %p2122_p6 = por %p2121_p13, %p2120_p4 }
  0x5b   : > { %p2123_p10 = pnand %p2122_p6, %p2116_p7 }
  0x5d   : > { %2126 = shalt.err (!%p2123_p10)
}
  0x5e   : > { %s2206_s21 = smov 512   ;;  %s2207_s26 = smov 32  }
  0x5f   : > { %1907 = dma.hbm_to_vmem [thread:$0]  (!%p2369_p11), %s2365_s24, 8192, %s2367_s27, %s2373_s22, %s2206_s21, %s2206_s21, %s2207_s26  }
  0x60   : > { %182 = sbr.rel (%p2272_p8) target bundleno = 655 (0x28f), region = 32  ;;  %s2404_s29 = sand.u32 (!%p2272_p8), 1, %s2189_s13  }
  0x61   : > { %s1615_s30 = sshll.u32 (!%p2272_p8), %s2404_s29, 9  ;;  %s185_s4 = scalar_lea.sflag (!%p2272_p8), [#allocation3], %s2404_s29 }
  0x62   : > { %s2408_s5 = scalar_lea.vmem (!%p2272_p8), [#allocation2], %s1615_s30  ;;  %p2598_p4 = scmp.ne.s32.totalorder (!%p2272_p8), %s2591_s18, 0 }
  0x67   : > { %2172 = dma.done.wait (%p2598_p4), %s185_s4, 8192  }
  0x68   : > { %2174 = vsyncadd (%p2598_p4), %s185_s4, 4294959104  ;;  %p2599_p7 = scmp.eq.s32.totalorder %s2253_s16, 0 }
  0x6a   : > { %2176 = dma.done.wait (%p2599_p7), [#allocation6], 8192   ;;  %p2600_p8 = pmov %p2599_p7 }
  0x6b   : > { %v1961_v0 = vld [vmem:[#allocation5 + $0x40] sm:$0xff]   ;;  %v1965_v4 = vld [vmem:[#allocation5 + $0x48] sm:$0xff]   ;;  %v1969_v8 = vld [vmem:[#allocation5 + $0x50] sm:$0xff]   ;;  %s1618_s18 = sshll.u32 %s2404_s29, 8  ;;  %s1756_s24 = sshll.u32 %s2253_s16, 12 }
  0x6c   : > { %2178 = vsyncadd (%p2600_p8), [#allocation6], 4294959104  ;;  %v1962_v1 = vld [vmem:[#allocation5 + $0xc0] sm:$0xff]   ;;  %1757 = vmatprep.subr.bf16.mxu0 %v1961_v0  ;;  %v1966_v5 = vld [vmem:[#allocation5 + $0xc8] sm:$0xff]   ;;  %s2499_s20 = scalar_lea.vmem [#allocation8], %s1618_s18  ;;  %s2534_s7 = scalar_lea.hbm %s2587_s3, %s1756_s24 }
  0x6d   : > { %v1963_v2 = vld [vmem:[#allocation5] sm:$0xff]   ;;  %1821 = vmatprep.subr.bf16.mxu1 %v1962_v1  ;;  %v1967_v6 = vld [vmem:[#allocation5 + $0x8] sm:$0xff]   ;;  %v1970_v9 = vld [vmem:[#allocation5 + $0xd0] sm:$0xff]   ;;  %s1513_s27 = sshll.u32 %s2499_s20, 4  ;;  %s1499_s16 = scalar_lea.sflag [#allocation4], %s2404_s29  ;;  %s2536_s27 = int_to_ptr.vmem [resolvable:$true] %s1513_s27 }
  0x6e   : > { %v1964_v3 = vld [vmem:[#allocation5 + $0x80] sm:$0xff]   ;;  %1758 = vmatpush3.bf16.msra.mxu0 %v1963_v2  ;;  %v1968_v7 = vld [vmem:[#allocation5 + $0x88] sm:$0xff]   ;;  %v1971_v10 = vld [vmem:[#allocation5 + $0x10] sm:$0xff]   ;;  %s2127_s8 = scalar_lea.vmem %s2536_s27, 4096  ;;  %p2601_p0 = scmp.ne.s32.totalorder %s2596_s10, 0 }
  0x6f   : > { %1822 = vmatpush3.bf16.msra.mxu1 %v1964_v3  ;;  %1759 = vmatprep.subr.bf16.mxu0 %v1965_v4  ;;  %v1972_v11 = vld [vmem:[#allocation5 + $0x90] sm:$0xff]   ;;  %v1973_v12 = vld [vmem:[#allocation5 + $0x58] sm:$0xff]   ;;  %v1977_v16 = vld [vmem:[#allocation5 + $0x60] sm:$0xff]   ;;  %p2128_p11 = scmp.ne.s32.totalorder %s2536_s27, %s2127_s8  ;;  %s2209_s23 = smov [#allocation8]  }
  0x70   : > { %1823 = vmatprep.subr.bf16.mxu1 %v1966_v5  ;;  %v1974_v13 = vld [vmem:[#allocation5 + $0xd8] sm:$0xff]   ;;  %v1978_v17 = vld [vmem:[#allocation5 + $0xe0] sm:$0xff]   ;;  %v1981_v20 = vld [vmem:[#allocation5 + $0x68] sm:$0xff]   ;;  %s2131_s11 = sshll.u32 %s2209_s23, 4  ;;  %s2132_s11 = int_to_ptr.vmem [resolvable:$false] %s2131_s11 }
  0x71   : > { %v1975_v14 = vld [vmem:[#allocation5 + $0x18] sm:$0xff]   ;;  %v1979_v18 = vld [vmem:[#allocation5 + $0x20] sm:$0xff]   ;;  %v1982_v21 = vld [vmem:[#allocation5 + $0xe8] sm:$0xff]   ;;  %p2129_p1 = pnand %p2128_p11, %p2601_p0  ;;  %s2133_s25 = scalar_lea.vmem %s2132_s11, 8192 }
  0x72   : > { %1760 = vmatpush3.bf16.msra.mxu0 %v1967_v6  ;;  %v1976_v15 = vld [vmem:[#allocation5 + $0x98] sm:$0xff]   ;;  %v1980_v19 = vld [vmem:[#allocation5 + $0xa0] sm:$0xff]   ;;  %v1983_v22 = vld [vmem:[#allocation5 + $0x28] sm:$0xff]   ;;  %p2134_p5 = scmp.lt.s32.totalorder %s2536_s27, %s2132_s11  ;;  %p2135_p9 = scmp.lt.s32.totalorder %s2133_s25, %s2127_s8 }
  0x73   : > { %1824 = vmatpush3.bf16.msra.mxu1 %v1968_v7  ;;  %1761 = vmatprep.subr.bf16.mxu0 %v1969_v8  ;;  %v1984_v23 = vld [vmem:[#allocation5 + $0xa8] sm:$0xff]   ;;  %v1985_v24 = vld [vmem:[#allocation5 + $0x70] sm:$0xff]   ;;  %v1989_v28 = vld [vmem:[#allocation5 + $0x78] sm:$0xff]   ;;  %p2130_p3 = pneg %p2129_p1 }
  0x74   : > { %1825 = vmatprep.subr.bf16.mxu1 %v1970_v9  ;;  %v1986_v25 = vld [vmem:[#allocation5 + $0xf0] sm:$0xff]   ;;  %v1990_v29 = vld [vmem:[#allocation5 + $0xf8] sm:$0xff]   ;;  %v223_v32 = vld [vmem:[%s2408_s5 + $0x8] sm:$0xff]  ;;  %p2136_p12 = por %p2135_p9, %p2134_p5 }
  0x75   : > { %v1987_v26 = vld [vmem:[#allocation5 + $0x30] sm:$0xff]   ;;  %v1991_v30 = vld [vmem:[#allocation5 + $0x38] sm:$0xff]   ;;  %v227_v33 = vld [vmem:[%s2408_s5 + $0x28] sm:$0xff] }
  0x76   : > { %1762 = vmatpush3.bf16.msra.mxu0 %v1971_v10  ;;  %v1988_v27 = vld [vmem:[#allocation5 + $0xb0] sm:$0xff]   ;;  %v1992_v31 = vld [vmem:[#allocation5 + $0xb8] sm:$0xff]   ;;  %v287_v35 = vpack.c.bf16 %v227_v33, %v223_v32  ;;  %v222_v37 = vld [vmem:[%s2408_s5] sm:$0xff]  ;;  %p2137_p2 = pnand %p2136_p12, %p2130_p3 }
  0x77   : > { %1826 = vmatpush3.bf16.msra.mxu1 %v1972_v11  ;;  %1763 = vmatprep.subr.bf16.mxu0 %v1973_v12  ;;  %v225_v34 = vld [vmem:[%s2408_s5 + $0x18] sm:$0xff]  ;;  %v226_v38 = vld [vmem:[%s2408_s5 + $0x20] sm:$0xff]  ;;  %v224_v41 = vld [vmem:[%s2408_s5 + $0x10] sm:$0xff] }
  0x78   : > { %1827 = vmatprep.subr.bf16.mxu1 %v1974_v13  ;;  %v229_v36 = vld [vmem:[%s2408_s5 + $0x38] sm:$0xff]  ;;  %v286_v40 = vpack.c.bf16 %v226_v38, %v222_v37  ;;  %v228_v42 = vld [vmem:[%s2408_s5 + $0x30] sm:$0xff]  ;;  %v231_v43 = vld [vmem:[%s2408_s5 + $0x48] sm:$0xff]  ;;  %606 = vmatprep.mubr.bf16.mxu0 %v287_v35 }
  0x79   : > { %v289_v39 = vpack.c.bf16 %v229_v36, %v225_v34  ;;  %v288_v44 = vpack.c.bf16 %v228_v42, %v224_v41  ;;  %v235_v45 = vld [vmem:[%s2408_s5 + $0x68] sm:$0xff]  ;;  %v233_v46 = vld [vmem:[%s2408_s5 + $0x58] sm:$0xff]  ;;  %v230_v50 = vld [vmem:[%s2408_s5 + $0x40] sm:$0xff] }
  0x7a   : > { %1764 = vmatpush3.bf16.msra.mxu0 %v1975_v14  ;;  %v237_v47 = vld [vmem:[%s2408_s5 + $0x78] sm:$0xff]  ;;  %v291_v48 = vpack.c.bf16 %v235_v45, %v231_v43  ;;  %v234_v51 = vld [vmem:[%s2408_s5 + $0x60] sm:$0xff]  ;;  %v232_v52 = vld [vmem:[%s2408_s5 + $0x50] sm:$0xff] }
  0x7b   : > { %1828 = vmatpush3.bf16.msra.mxu1 %v1976_v15  ;;  %1765 = vmatprep.subr.bf16.mxu0 %v1977_v16  ;;  %v293_v49 = vpack.c.bf16 %v237_v47, %v233_v46  ;;  %v236_v53 = vld [vmem:[%s2408_s5 + $0x70] sm:$0xff]  ;;  %v239_v54 = vld [vmem:[%s2408_s5 + $0x88] sm:$0xff]  ;;  %v241_v56 = vld [vmem:[%s2408_s5 + $0x98] sm:$0xff]  ;;  %v290_v58 = vpack.c.bf16 %v234_v51, %v230_v50 }
  0x7c   : > { %1829 = vmatprep.subr.bf16.mxu1 %v1978_v17  ;;  %703 = vmatprep.mubr.bf16.mxu1 %v289_v39  ;;  %v243_v55 = vld [vmem:[%s2408_s5 + $0xa8] sm:$0xff]  ;;  %v245_v57 = vld [vmem:[%s2408_s5 + $0xb8] sm:$0xff]  ;;  %v292_v59 = vpack.c.bf16 %v236_v53, %v232_v52  ;;  %v238_v62 = vld [vmem:[%s2408_s5 + $0x80] sm:$0xff] }
  0x7d   : > { %v295_v60 = vpack.c.bf16 %v243_v55, %v239_v54  ;;  %v297_v61 = vpack.c.bf16 %v245_v57, %v241_v56  ;;  %v242_v63 = vld [vmem:[%s2408_s5 + $0xa0] sm:$0xff]  ;;  %v240_v0 = vld [vmem:[%s2408_s5 + $0x90] sm:$0xff]  ;;  %v247_v2 = vld [vmem:[%s2408_s5 + $0xc8] sm:$0xff] }
  0x7e   : > { %1766 = vmatpush3.bf16.msra.mxu0 %v1979_v18  ;;  %v244_v1 = vld [vmem:[%s2408_s5 + $0xb0] sm:$0xff]  ;;  %v251_v3 = vld [vmem:[%s2408_s5 + $0xe8] sm:$0xff]  ;;  %v249_v4 = vld [vmem:[%s2408_s5 + $0xd8] sm:$0xff]  ;;  %v294_v6 = vpack.c.bf16 %v242_v63, %v238_v62 }
  0x7f   : > { %1830 = vmatpush3.bf16.msra.mxu1 %v1980_v19  ;;  %1767 = vmatprep.subr.bf16.mxu0 %v1981_v20  ;;  %v253_v5 = vld [vmem:[%s2408_s5 + $0xf8] sm:$0xff]  ;;  %v296_v7 = vpack.c.bf16 %v244_v1, %v240_v0  ;;  %v299_v8 = vpack.c.bf16 %v251_v3, %v247_v2  ;;  %v246_v10 = vld [vmem:[%s2408_s5 + $0xc0] sm:$0xff]  ;;  %v248_v12 = vld [vmem:[%s2408_s5 + $0xd0] sm:$0xff] }
  0x80   : > { %1831 = vmatprep.subr.bf16.mxu1 %v1982_v21  ;;  %v301_v9 = vpack.c.bf16 %v253_v5, %v249_v4  ;;  %v250_v11 = vld [vmem:[%s2408_s5 + $0xe0] sm:$0xff]  ;;  %v252_v13 = vld [vmem:[%s2408_s5 + $0xf0] sm:$0xff]  ;;  %v255_v14 = vld [vmem:[%s2408_s5 + $0x108] sm:$0xff] }
  0x81   : > { %v259_v15 = vld [vmem:[%s2408_s5 + $0x128] sm:$0xff]  ;;  %v257_v16 = vld [vmem:[%s2408_s5 + $0x118] sm:$0xff]  ;;  %v1993_v18 = vld [vmem:[#allocation7] ss:$16 sps:$4 sm:$0xff]  }
  0x82   : > { %1768 = vmatpush3.bf16.msra.mxu0 %v1983_v22  ;;  %v261_v17 = vld [vmem:[%s2408_s5 + $0x138] sm:$0xff]  ;;  %v1995_v19 = vld [vmem:[#allocation7 + $0x4] ss:$16 sps:$4 sm:$0xff]   ;;  %v298_v22 = vpack.c.bf16 %v250_v11, %v246_v10  ;;  %v263_v35 = vld [vmem:[%s2408_s5 + $0x148] sm:$0xff] }
  0x83   : > { %1832 = vmatpush3.bf16.msra.mxu1 %v1984_v23  ;;  %1769 = vmatprep.subr.bf16.mxu0 %v1985_v24  ;;  %v1996_v20 = vld [vmem:[#allocation7 + $0x8] ss:$16 sps:$4 sm:$0xff]   ;;  %v1998_v21 = vld [vmem:[#allocation7 + $0xc] ss:$16 sps:$4 sm:$0xff]   ;;  %v300_v23 = vpack.c.bf16 %v252_v13, %v248_v12  ;;  %v303_v24 = vpack.c.bf16 %v259_v15, %v255_v14  ;;  %v2007_v32 = vld [vmem:[#allocation7 + $0x44] ss:$16 sps:$4 sm:$0xff]  }
  0x84   : > { %1833 = vmatprep.subr.bf16.mxu1 %v1986_v25  ;;  %v2001_v25 = vld [vmem:[#allocation7 + $0x24] ss:$16 sps:$4 sm:$0xff]   ;;  %v267_v36 = vld [vmem:[%s2408_s5 + $0x168] sm:$0xff]  ;;  %v265_v37 = vld [vmem:[%s2408_s5 + $0x158] sm:$0xff] }
  0x85   : > { %v256_v33 = vld [vmem:[%s2408_s5 + $0x110] sm:$0xff]  ;;  %v2010_v38 = vld [vmem:[#allocation7 + $0x4c] ss:$16 sps:$4 sm:$0xff]   ;;  %v2008_v41 = vld [vmem:[#allocation7 + $0x48] ss:$16 sps:$4 sm:$0xff]   ;;  %v307_v46 = vpack.c.bf16 %v267_v36, %v263_v35 }
  0x86   : > { %1770 = vmatpush3.bf16.msra.mxu0 %v1987_v26  ;;  %v305_v26 = vpack.c.bf16 %v261_v17, %v257_v16  ;;  %v260_v34 = vld [vmem:[%s2408_s5 + $0x130] sm:$0xff]  ;;  %v269_v39 = vld [vmem:[%s2408_s5 + $0x178] sm:$0xff]  ;;  %v266_v50 = vld [vmem:[%s2408_s5 + $0x160] sm:$0xff] }
  0x87   : > { %1834 = vmatpush3.bf16.msra.mxu1 %v1988_v27  ;;  %1771 = vmatprep.subr.bf16.mxu0 %v1989_v28  ;;  %v1999_v27 = vld [vmem:[#allocation7 + $0x20] ss:$16 sps:$4 sm:$0xff]   ;;  %v2004_v28 = vld [vmem:[#allocation7 + $0x2c] ss:$16 sps:$4 sm:$0xff]   ;;  %v2013_v42 = vld [vmem:[#allocation7 + $0x64] ss:$16 sps:$4 sm:$0xff]   ;;  %v304_v45 = vpack.c.bf16 %v260_v34, %v256_v33  ;;  %v309_v47 = vpack.c.bf16 %v269_v39, %v265_v37 }
  0x88   : > { %1835 = vmatprep.subr.bf16.mxu1 %v1990_v29  ;;  %v254_v29 = vld [vmem:[%s2408_s5 + $0x100] sm:$0xff]  ;;  %v2014_v51 = vld [vmem:[#allocation7 + $0x68] ss:$16 sps:$4 sm:$0xff]   ;;  %v264_v53 = vld [vmem:[%s2408_s5 + $0x150] sm:$0xff] }
  0x89   : > { %v2019_v52 = vld [vmem:[#allocation7 + $0x84] ss:$16 sps:$4 sm:$0xff]   ;;  %v271_v55 = vld [vmem:[%s2408_s5 + $0x188] sm:$0xff]  ;;  %v2023_v4 = vld [vmem:[#allocation7 + $0xa0] ss:$16 sps:$4 sm:$0xff]  }
  0x8a   : > { %1772 = vmatpush3.bf16.msra.mxu0 %v1991_v30  ;;  %v258_v30 = vld [vmem:[%s2408_s5 + $0x120] sm:$0xff]  ;;  %v268_v54 = vld [vmem:[%s2408_s5 + $0x170] sm:$0xff]  ;;  %v275_v56 = vld [vmem:[%s2408_s5 + $0x1a8] sm:$0xff] }
  0x8b   : > { %1836 = vmatpush3.bf16.msra.mxu1 %v1992_v31  ;;  %984 = vmatprep.subr.bf16.mxu0 %v1995_v19  ;;  %v2002_v31 = vld [vmem:[#allocation7 + $0x28] ss:$16 sps:$4 sm:$0xff]   ;;  %v302_v43 = vpack.c.bf16 %v258_v30, %v254_v29  ;;  %v2022_v57 = vld [vmem:[#allocation7 + $0x8c] ss:$16 sps:$4 sm:$0xff]   ;;  %v2025_v62 = vld [vmem:[#allocation7 + $0xa4] ss:$16 sps:$4 sm:$0xff]   ;;  %v308_v1 = vpack.c.bf16 %v268_v54, %v264_v53  ;;  %v311_v2 = vpack.c.bf16 %v275_v56, %v271_v55 }
  0x8c   : > { %1097 = vmatprep.subr.bf16.mxu1 %v1998_v21  ;;  %v2028_v63 = vld [vmem:[#allocation7 + $0xac] ss:$16 sps:$4 sm:$0xff]   ;;  %v2026_v5 = vld [vmem:[#allocation7 + $0xa8] ss:$16 sps:$4 sm:$0xff]   ;;  %v272_v10 = vld [vmem:[%s2408_s5 + $0x190] sm:$0xff] }
  0x8d   : > { %607 = vmatmul.mubr.bf16.vlgmr.msra.gmra.mrb[0].mxu0 %v286_v40  ;;  %v2005_v40 = vld [vmem:[#allocation7 + $0x40] ss:$16 sps:$4 sm:$0xff]   ;;  %v279_v12 = vld [vmem:[%s2408_s5 + $0x1c8] sm:$0xff]  ;;  %v281_v15 = vld [vmem:[%s2408_s5 + $0x1d8] sm:$0xff] }
  0x8e   : > { %704 = vmatmul.mubr.bf16.vlgmr.msra.gmra.mrb[0].mxu1 %v288_v44  ;;  %614 = vmatprep.mubr.bf16.mxu0 %v291_v48  ;;  %v2016_v44 = vld [vmem:[#allocation7 + $0x6c] ss:$16 sps:$4 sm:$0xff]   ;;  %v2011_v48 = vld [vmem:[#allocation7 + $0x60] ss:$16 sps:$4 sm:$0xff]   ;;  %v2032_v17 = vld [vmem:[#allocation7 + $0xc8] ss:$16 sps:$4 sm:$0xff]  }
  0x8f   : > { %711 = vmatprep.mubr.bf16.mxu1 %v293_v49  ;;  %985 = vmatpush1.bf16.msra.mxu0 %v1993_v18  ;;  %v262_v49 = vld [vmem:[%s2408_s5 + $0x140] sm:$0xff]  ;;  %v276_v11 = vld [vmem:[%s2408_s5 + $0x1b0] sm:$0xff]  ;;  %v283_v13 = vld [vmem:[%s2408_s5 + $0x1e8] sm:$0xff] }
  0x90   : > { %1098 = vmatpush1.bf16.msra.mxu1 %v1996_v20  ;;  %986 = vmatprep.subr.bf16.mxu0 %v2001_v25  ;;  %v306_v0 = vpack.c.bf16 %v266_v50, %v262_v49  ;;  %v2029_v14 = vld [vmem:[#allocation7 + $0xc0] ss:$16 sps:$4 sm:$0xff]   ;;  %v285_v16 = vld [vmem:[%s2408_s5 + $0x1f8] sm:$0xff]  ;;  %v312_v19 = vpack.c.bf16 %v276_v11, %v272_v10  ;;  %v315_v20 = vpack.c.bf16 %v283_v13, %v279_v12 }
  0x91   : > { %1099 = vmatprep.subr.bf16.mxu1 %v2004_v28  ;;  %v317_v21 = vpack.c.bf16 %v285_v16, %v281_v15  ;;  %v284_v25 = vld [vmem:[%s2408_s5 + $0x1f0] sm:$0xff]  ;;  %v2040_v29 = vld [vmem:[#allocation7 + $0xec] ss:$16 sps:$4 sm:$0xff]  }
  0x92   : > { %v2037_v28 = vld [vmem:[#allocation7 + $0xe4] ss:$16 sps:$4 sm:$0xff]   ;;  %v2035_v30 = vld [vmem:[#allocation7 + $0xe0] ss:$16 sps:$4 sm:$0xff]  }
  0x93   : > { %987 = vmatpush1.bf16.msra.mxu0 %v1999_v27 }
  0x94   : > { %1100 = vmatpush1.bf16.msra.mxu1 %v2002_v31  ;;  %988 = vmatprep.subr.bf16.mxu0 %v2007_v32  ;;  %v2038_v31 = vld [vmem:[#allocation7 + $0xe8] ss:$16 sps:$4 sm:$0xff]   ;;  %v2208_v32 = vmov 0  }
  0x95   : > { %615 = vmatmul.mubr.bf16.gmra.mrb[4].mxu0 %v290_v58  ;;  %1101 = vmatprep.subr.bf16.mxu1 %v2010_v38  ;;  %v273_v58 = vld [vmem:[%s2408_s5 + $0x198] sm:$0xff] }
  0x96   : > { %712 = vmatmul.mubr.bf16.gmra.mrb[4].mxu1 %v292_v59  ;;  %622 = vmatprep.mubr.bf16.mxu0 %v295_v60  ;;  %v277_v59 = vld [vmem:[%s2408_s5 + $0x1b8] sm:$0xff]  ;;  %v2017_v60 = vld [vmem:[#allocation7 + $0x80] ss:$16 sps:$4 sm:$0xff]  }
  0x97   : > { %719 = vmatprep.mubr.bf16.mxu1 %v297_v61  ;;  %989 = vmatpush1.bf16.msra.mxu0 %v2005_v40  ;;  %v2020_v61 = vld [vmem:[#allocation7 + $0x88] ss:$16 sps:$4 sm:$0xff]   ;;  %v313_v3 = vpack.c.bf16 %v277_v59, %v273_v58 }
  0x98   : > { %1102 = vmatpush1.bf16.msra.mxu1 %v2008_v41  ;;  %990 = vmatprep.subr.bf16.mxu0 %v2013_v42 }
  0x99   : > { %1103 = vmatprep.subr.bf16.mxu1 %v2016_v44 }
  0x9b   : > { %991 = vmatpush1.bf16.msra.mxu0 %v2011_v48 }
  0x9c   : > { %1104 = vmatpush1.bf16.msra.mxu1 %v2014_v51  ;;  %992 = vmatprep.subr.bf16.mxu0 %v2019_v52 }
  0x9d   : > { %623 = vmatmul.mubr.bf16.gmra.mrb[8].mxu0 %v294_v6  ;;  %1105 = vmatprep.subr.bf16.mxu1 %v2022_v57  ;;  %v2031_v6 = vld [vmem:[#allocation7 + $0xc4] ss:$16 sps:$4 sm:$0xff]  }
  0x9e   : > { %720 = vmatmul.mubr.bf16.gmra.mrb[8].mxu1 %v296_v7  ;;  %630 = vmatprep.mubr.bf16.mxu0 %v299_v8  ;;  %v270_v7 = vld [vmem:[%s2408_s5 + $0x180] sm:$0xff]  ;;  %v2034_v8 = vld [vmem:[#allocation7 + $0xcc] ss:$16 sps:$4 sm:$0xff]  }
  0x9f   : > { %727 = vmatprep.mubr.bf16.mxu1 %v301_v9  ;;  %993 = vmatpush1.bf16.msra.mxu0 %v2017_v60  ;;  %v274_v9 = vld [vmem:[%s2408_s5 + $0x1a0] sm:$0xff] }
  0xa0   : > { %1106 = vmatpush1.bf16.msra.mxu1 %v2020_v61  ;;  %994 = vmatprep.subr.bf16.mxu0 %v2025_v62  ;;  %v310_v18 = vpack.c.bf16 %v274_v9, %v270_v7 }
  0xa1   : > { %1107 = vmatprep.subr.bf16.mxu1 %v2028_v63 }
  0xa3   : > { %995 = vmatpush1.bf16.msra.mxu0 %v2023_v4 }
  0xa4   : > { %1108 = vmatpush1.bf16.msra.mxu1 %v2026_v5  ;;  %996 = vmatprep.subr.bf16.mxu0 %v2031_v6 }
  0xa5   : > { %631 = vmatmul.mubr.bf16.gmra.mrb[12].mxu0 %v298_v22  ;;  %1109 = vmatprep.subr.bf16.mxu1 %v2034_v8  ;;  %v278_v22 = vld [vmem:[%s2408_s5 + $0x1c0] sm:$0xff] }
  0xa6   : > { %728 = vmatmul.mubr.bf16.gmra.mrb[12].mxu1 %v300_v23  ;;  %638 = vmatprep.mubr.bf16.mxu0 %v303_v24  ;;  %v282_v23 = vld [vmem:[%s2408_s5 + $0x1e0] sm:$0xff]  ;;  %v280_v24 = vld [vmem:[%s2408_s5 + $0x1d0] sm:$0xff] }
  0xa7   : > { %735 = vmatprep.mubr.bf16.mxu1 %v305_v26  ;;  %997 = vmatpush1.bf16.msra.mxu0 %v2029_v14  ;;  %v314_v26 = vpack.c.bf16 %v282_v23, %v278_v22  ;;  %v316_v27 = vpack.c.bf16 %v284_v25, %v280_v24 }
  0xa8   : > { %1110 = vmatpush1.bf16.msra.mxu1 %v2032_v17  ;;  %998 = vmatprep.subr.bf16.mxu0 %v2037_v28 }
  0xa9   : > { %1111 = vmatprep.subr.bf16.mxu1 %v2040_v29 }
  0xab   : > { %999 = vmatpush1.bf16.msra.mxu0 %v2035_v30 }
  0xac   : > { %1112 = vmatpush1.bf16.msra.mxu1 %v2038_v31 }
  0xad   : > { %639 = vmatmul.mubr.bf16.gmra.mrb[16].mxu0 %v302_v43 }
  0xae   : > { %736 = vmatmul.mubr.bf16.gmra.mrb[16].mxu1 %v304_v45  ;;  %646 = vmatprep.mubr.bf16.mxu0 %v307_v46 }
  0xaf   : > { %743 = vmatprep.mubr.bf16.mxu1 %v309_v47 }
  0xb5   : > { %647 = vmatmul.mubr.bf16.gmra.mrb[20].mxu0 %v306_v0 }
  0xb6   : > { %744 = vmatmul.mubr.bf16.gmra.mrb[20].mxu1 %v308_v1  ;;  %654 = vmatprep.mubr.bf16.mxu0 %v311_v2 }
  0xb7   : > { %751 = vmatprep.mubr.bf16.mxu1 %v313_v3 }
  0xbd   : > { %655 = vmatmul.mubr.bf16.gmra.mrb[24].mxu0 %v310_v18 }
  0xbe   : > { %752 = vmatmul.mubr.bf16.gmra.mrb[24].mxu1 %v312_v19  ;;  %662 = vmatprep.mubr.bf16.mxu0 %v315_v20 }
  0xbf   : > { %759 = vmatprep.mubr.bf16.mxu1 %v317_v21 }
  0xc5   : > { %663 = vmatmul.mubr.bf16.gmra.mrb[28].mxu0 %v314_v26 }
  0xc6   : > { %760 = vmatmul.mubr.bf16.gmra.mrb[28].mxu1 %v316_v27  ;;  %1016 = vmatprep.mubr.bf16.mxu0 %v2208_v32 }
  0xc7   : > { %1129 = vmatprep.mubr.bf16.mxu1 %v2208_v32 }
 0x160   : > { %v1773_v33 = vpop.f32.mrb[0].mxu0 }
 0x161   : > { %v1837_v34 = vpop.f32.mrb[0].mxu1  ;;  %v1774_v35 = vpop.f32.mrb[1].mxu0 }
 0x162   : > { %v1775_v36 = vadd.f32 %v1774_v35, %v1773_v33  ;;  %v1838_v37 = vpop.f32.mrb[1].mxu1  ;;  %v1776_v38 = vpop.f32.mrb[2].mxu0 }
 0x163   : > { %v1839_v39 = vadd.f32 %v1838_v37, %v1837_v34  ;;  %v1840_v40 = vpop.f32.mrb[2].mxu1  ;;  %v1777_v41 = vpop.f32.mrb[3].mxu0 }
 0x164   : > { %v1778_v42 = vadd.f32 %v1777_v41, %v1776_v38  ;;  %v1841_v43 = vpop.f32.mrb[3].mxu1 }
 0x165   : > { %v706_v44 = vadd.f32 %v1839_v39, %v1775_v36  ;;  %v1842_v45 = vadd.f32 %v1841_v43, %v1840_v40 }
 0x167   : > { %v709_v46 = vadd.f32 %v1842_v45, %v1778_v42  ;;  %v768_v48 = vmax.f32 %v706_v44, 0.0 }
 0x168   : > { %v1779_v47 = vpop.f32.mrb[4].mxu0 }
 0x169   : > { %v769_v49 = vmax.f32 %v709_v46, 0.0  ;;  %v1843_v50 = vpop.f32.mrb[4].mxu1  ;;  %v1780_v51 = vpop.f32.mrb[5].mxu0 }
 0x16a   : > { %v1781_v52 = vadd.f32 %v1780_v51, %v1779_v47  ;;  %v1844_v53 = vpop.f32.mrb[5].mxu1  ;;  %v1782_v54 = vpop.f32.mrb[6].mxu0 }
 0x16b   : > { %v784_v55 = vpack.c.bf16 %v769_v49, %v768_v48  ;;  %v1845_v56 = vadd.f32 %v1844_v53, %v1843_v50  ;;  %v1846_v57 = vpop.f32.mrb[6].mxu1  ;;  %v1783_v58 = vpop.f32.mrb[7].mxu0 }
 0x16c   : > { %v1784_v59 = vadd.f32 %v1783_v58, %v1782_v54  ;;  %v1847_v60 = vpop.f32.mrb[7].mxu1 }
 0x16d   : > { %v714_v61 = vadd.f32 %v1845_v56, %v1781_v52  ;;  %v1848_v62 = vadd.f32 %v1847_v60, %v1846_v57  ;;  %1017 = vmatmul.mubr.bf16.vlgmr.msra.gmra.mrb[32].mxu0 %v784_v55  ;;  %1130 = vmatmul.mubr.bf16.vlgmr.msra.gmra.mrb[32].mxu1 %v784_v55 }
 0x16e   : > { %1026 = vmatprep.mubr.bf16.mxu0 %v2208_v32  ;;  %1139 = vmatprep.mubr.bf16.mxu1 %v2208_v32 }
 0x16f   : > { %v717_v63 = vadd.f32 %v1848_v62, %v1784_v59  ;;  %v770_v1 = vmax.f32 %v714_v61, 0.0 }
 0x170   : > { %v1785_v0 = vpop.f32.mrb[8].mxu0 }
 0x171   : > { %v771_v2 = vmax.f32 %v717_v63, 0.0  ;;  %v1849_v3 = vpop.f32.mrb[8].mxu1  ;;  %v1786_v4 = vpop.f32.mrb[9].mxu0 }
 0x172   : > { %v1787_v5 = vadd.f32 %v1786_v4, %v1785_v0  ;;  %v1850_v6 = vpop.f32.mrb[9].mxu1  ;;  %v1788_v7 = vpop.f32.mrb[10].mxu0 }
 0x173   : > { %v1851_v8 = vadd.f32 %v1850_v6, %v1849_v3  ;;  %v1852_v9 = vpop.f32.mrb[10].mxu1  ;;  %v1789_v10 = vpop.f32.mrb[11].mxu0  ;;  %v785_v11 = vpack.c.bf16 %v771_v2, %v770_v1 }
 0x174   : > { %v1790_v12 = vadd.f32 %v1789_v10, %v1788_v7  ;;  %v1853_v13 = vpop.f32.mrb[11].mxu1 }
 0x175   : > { %v722_v14 = vadd.f32 %v1851_v8, %v1787_v5  ;;  %v1854_v15 = vadd.f32 %v1853_v13, %v1852_v9  ;;  %1027 = vmatmul.mubr.bf16.gmra.mrb[36].mxu0 %v785_v11  ;;  %1140 = vmatmul.mubr.bf16.gmra.mrb[36].mxu1 %v785_v11 }
 0x176   : > { %1036 = vmatprep.mubr.bf16.mxu0 %v2208_v32  ;;  %1149 = vmatprep.mubr.bf16.mxu1 %v2208_v32 }
 0x177   : > { %v725_v16 = vadd.f32 %v1854_v15, %v1790_v12  ;;  %v772_v18 = vmax.f32 %v722_v14, 0.0 }
 0x178   : > { %v1791_v17 = vpop.f32.mrb[12].mxu0 }
 0x179   : > { %v773_v19 = vmax.f32 %v725_v16, 0.0  ;;  %v1855_v20 = vpop.f32.mrb[12].mxu1  ;;  %v1792_v21 = vpop.f32.mrb[13].mxu0 }
 0x17a   : > { %v1793_v22 = vadd.f32 %v1792_v21, %v1791_v17  ;;  %v1856_v23 = vpop.f32.mrb[13].mxu1  ;;  %v1794_v24 = vpop.f32.mrb[14].mxu0 }
 0x17b   : > { %v1857_v25 = vadd.f32 %v1856_v23, %v1855_v20  ;;  %v1858_v26 = vpop.f32.mrb[14].mxu1  ;;  %v1795_v27 = vpop.f32.mrb[15].mxu0  ;;  %v786_v28 = vpack.c.bf16 %v773_v19, %v772_v18 }
 0x17c   : > { %v1796_v29 = vadd.f32 %v1795_v27, %v1794_v24  ;;  %v1859_v30 = vpop.f32.mrb[15].mxu1 }
 0x17d   : > { %v730_v31 = vadd.f32 %v1857_v25, %v1793_v22  ;;  %v1860_v33 = vadd.f32 %v1859_v30, %v1858_v26  ;;  %1037 = vmatmul.mubr.bf16.gmra.mrb[40].mxu0 %v786_v28  ;;  %1150 = vmatmul.mubr.bf16.gmra.mrb[40].mxu1 %v786_v28 }
 0x17e   : > { %1046 = vmatprep.mubr.bf16.mxu0 %v2208_v32  ;;  %1159 = vmatprep.mubr.bf16.mxu1 %v2208_v32 }
 0x17f   : > { %v733_v34 = vadd.f32 %v1860_v33, %v1796_v29  ;;  %v774_v36 = vmax.f32 %v730_v31, 0.0 }
 0x180   : > { %v1797_v35 = vpop.f32.mrb[16].mxu0 }
 0x181   : > { %v775_v37 = vmax.f32 %v733_v34, 0.0  ;;  %v1861_v38 = vpop.f32.mrb[16].mxu1  ;;  %v1798_v39 = vpop.f32.mrb[17].mxu0 }
 0x182   : > { %v1799_v40 = vadd.f32 %v1798_v39, %v1797_v35  ;;  %v1862_v41 = vpop.f32.mrb[17].mxu1  ;;  %v1800_v42 = vpop.f32.mrb[18].mxu0 }
 0x183   : > { %v1863_v43 = vadd.f32 %v1862_v41, %v1861_v38  ;;  %v1864_v44 = vpop.f32.mrb[18].mxu1  ;;  %v1801_v45 = vpop.f32.mrb[19].mxu0  ;;  %v787_v46 = vpack.c.bf16 %v775_v37, %v774_v36 }
 0x184   : > { %v1802_v47 = vadd.f32 %v1801_v45, %v1800_v42  ;;  %v1865_v48 = vpop.f32.mrb[19].mxu1 }
 0x185   : > { %v738_v49 = vadd.f32 %v1863_v43, %v1799_v40  ;;  %v1866_v50 = vadd.f32 %v1865_v48, %v1864_v44  ;;  %1047 = vmatmul.mubr.bf16.gmra.mrb[44].mxu0 %v787_v46  ;;  %1160 = vmatmul.mubr.bf16.gmra.mrb[44].mxu1 %v787_v46 }
 0x186   : > { %1056 = vmatprep.mubr.bf16.mxu0 %v2208_v32  ;;  %1169 = vmatprep.mubr.bf16.mxu1 %v2208_v32 }
 0x187   : > { %v741_v51 = vadd.f32 %v1866_v50, %v1802_v47  ;;  %v776_v53 = vmax.f32 %v738_v49, 0.0 }
 0x188   : > { %v1803_v52 = vpop.f32.mrb[20].mxu0 }
 0x189   : > { %v777_v54 = vmax.f32 %v741_v51, 0.0  ;;  %v1867_v55 = vpop.f32.mrb[20].mxu1  ;;  %v1804_v56 = vpop.f32.mrb[21].mxu0 }
 0x18a   : > { %v1805_v57 = vadd.f32 %v1804_v56, %v1803_v52  ;;  %v1868_v58 = vpop.f32.mrb[21].mxu1  ;;  %v1806_v59 = vpop.f32.mrb[22].mxu0 }
 0x18b   : > { %v1869_v60 = vadd.f32 %v1868_v58, %v1867_v55  ;;  %v1870_v61 = vpop.f32.mrb[22].mxu1  ;;  %v1807_v62 = vpop.f32.mrb[23].mxu0  ;;  %v788_v63 = vpack.c.bf16 %v777_v54, %v776_v53 }
 0x18c   : > { %v1808_v0 = vadd.f32 %v1807_v62, %v1806_v59  ;;  %v1871_v1 = vpop.f32.mrb[23].mxu1 }
 0x18d   : > { %v746_v2 = vadd.f32 %v1869_v60, %v1805_v57  ;;  %v1872_v3 = vadd.f32 %v1871_v1, %v1870_v61  ;;  %1057 = vmatmul.mubr.bf16.gmra.mrb[48].mxu0 %v788_v63  ;;  %1170 = vmatmul.mubr.bf16.gmra.mrb[48].mxu1 %v788_v63 }
 0x18e   : > { %1066 = vmatprep.mubr.bf16.mxu0 %v2208_v32  ;;  %1179 = vmatprep.mubr.bf16.mxu1 %v2208_v32 }
 0x18f   : > { %v749_v4 = vadd.f32 %v1872_v3, %v1808_v0  ;;  %v778_v6 = vmax.f32 %v746_v2, 0.0 }
 0x190   : > { %v1809_v5 = vpop.f32.mrb[24].mxu0 }
 0x191   : > { %v779_v7 = vmax.f32 %v749_v4, 0.0  ;;  %v1873_v8 = vpop.f32.mrb[24].mxu1  ;;  %v1810_v9 = vpop.f32.mrb[25].mxu0 }
 0x192   : > { %v1811_v10 = vadd.f32 %v1810_v9, %v1809_v5  ;;  %v1874_v11 = vpop.f32.mrb[25].mxu1  ;;  %v1812_v12 = vpop.f32.mrb[26].mxu0 }
 0x193   : > { %v1875_v13 = vadd.f32 %v1874_v11, %v1873_v8  ;;  %v1876_v14 = vpop.f32.mrb[26].mxu1  ;;  %v1813_v15 = vpop.f32.mrb[27].mxu0  ;;  %v789_v16 = vpack.c.bf16 %v779_v7, %v778_v6 }
 0x194   : > { %v1814_v17 = vadd.f32 %v1813_v15, %v1812_v12  ;;  %v1877_v18 = vpop.f32.mrb[27].mxu1 }
 0x195   : > { %v754_v19 = vadd.f32 %v1875_v13, %v1811_v10  ;;  %v1878_v20 = vadd.f32 %v1877_v18, %v1876_v14  ;;  %1067 = vmatmul.mubr.bf16.gmra.mrb[52].mxu0 %v789_v16  ;;  %1180 = vmatmul.mubr.bf16.gmra.mrb[52].mxu1 %v789_v16 }
 0x196   : > { %1076 = vmatprep.mubr.bf16.mxu0 %v2208_v32  ;;  %1189 = vmatprep.mubr.bf16.mxu1 %v2208_v32 }
 0x197   : > { %v757_v21 = vadd.f32 %v1878_v20, %v1814_v17  ;;  %v780_v23 = vmax.f32 %v754_v19, 0.0 }
 0x198   : > { %v1815_v22 = vpop.f32.mrb[28].mxu0 }
 0x199   : > { %v781_v24 = vmax.f32 %v757_v21, 0.0  ;;  %v1879_v25 = vpop.f32.mrb[28].mxu1  ;;  %v1816_v26 = vpop.f32.mrb[29].mxu0 }
 0x19a   : > { %v1817_v27 = vadd.f32 %v1816_v26, %v1815_v22  ;;  %v1880_v28 = vpop.f32.mrb[29].mxu1  ;;  %v1818_v29 = vpop.f32.mrb[30].mxu0 }
 0x19b   : > { %v1881_v30 = vadd.f32 %v1880_v28, %v1879_v25  ;;  %v1882_v31 = vpop.f32.mrb[30].mxu1  ;;  %v1819_v33 = vpop.f32.mrb[31].mxu0  ;;  %v790_v34 = vpack.c.bf16 %v781_v24, %v780_v23 }
 0x19c   : > { %v1820_v35 = vadd.f32 %v1819_v33, %v1818_v29  ;;  %v1883_v36 = vpop.f32.mrb[31].mxu1 }
 0x19d   : > { %v762_v37 = vadd.f32 %v1881_v30, %v1817_v27  ;;  %v1884_v38 = vadd.f32 %v1883_v36, %v1882_v31  ;;  %1077 = vmatmul.mubr.bf16.gmra.mrb[56].mxu0 %v790_v34  ;;  %1190 = vmatmul.mubr.bf16.gmra.mrb[56].mxu1 %v790_v34 }
 0x19e   : > { %1086 = vmatprep.mubr.bf16.mxu0 %v2208_v32  ;;  %1199 = vmatprep.mubr.bf16.mxu1 %v2208_v32 }
 0x19f   : > { %v765_v39 = vadd.f32 %v1884_v38, %v1820_v35  ;;  %v782_v40 = vmax.f32 %v762_v37, 0.0 }
 0x1a1   : > { %v783_v41 = vmax.f32 %v765_v39, 0.0 }
 0x1a3   : > { %v791_v42 = vpack.c.bf16 %v783_v41, %v782_v40 }
 0x1a5   : > { %1087 = vmatmul.mubr.bf16.gmra.mrb[60].mxu0 %v791_v42  ;;  %1200 = vmatmul.mubr.bf16.gmra.mrb[60].mxu1 %v791_v42 }
 0x240   : > { %v1018_v43 = vpop.f32.mrb[32].mxu0  ;;  %v1131_v44 = vpop.f32.mrb[32].mxu1 }
 0x241   : > { %v1210_v45 = vmax.f32 %v1018_v43, 0.0  ;;  %v1212_v46 = vmax.f32 %v1131_v44, 0.0  ;;  %v1020_v47 = vpop.f32.mrb[33].mxu0  ;;  %v1133_v48 = vpop.f32.mrb[33].mxu1 }
 0x242   : > { %v1211_v49 = vmax.f32 %v1020_v47, 0.0  ;;  %v1213_v50 = vmax.f32 %v1133_v48, 0.0  ;;  %v1022_v51 = vpop.f32.mrb[34].mxu0  ;;  %v1135_v52 = vpop.f32.mrb[34].mxu1 }
 0x243   : > { %v1214_v53 = vmax.f32 %v1022_v51, 0.0  ;;  %v1216_v54 = vmax.f32 %v1135_v52, 0.0  ;;  %v1024_v32 = vpop.f32.mrb[35].mxu0  ;;  %v1137_v55 = vpop.f32.mrb[35].mxu1 }
 0x244   : > { %v1723_v56 = vpack.c.bf16 %v1211_v49, %v1210_v45  ;;  %v1724_v57 = vpack.c.bf16 %v1213_v50, %v1212_v46  ;;  %v1215_v58 = vmax.f32 %v1024_v32, 0.0  ;;  %v1217_v59 = vmax.f32 %v1137_v55, 0.0 }
 0x246   : > { %1466 = vst [vmem:[%s2499_s20] sm:$0xff] %v1723_v56  ;;  %1467 = vst [vmem:[%s2499_s20 + $0x8] sm:$0xff] %v1724_v57  ;;  %v1725_v60 = vpack.c.bf16 %v1215_v58, %v1214_v53  ;;  %v1726_v61 = vpack.c.bf16 %v1217_v59, %v1216_v54 }
 0x248   : > { %1468 = vst [vmem:[%s2499_s20 + $0x10] sm:$0xff] %v1725_v60  ;;  %1469 = vst [vmem:[%s2499_s20 + $0x18] sm:$0xff] %v1726_v61  ;;  %v1028_v62 = vpop.f32.mrb[36].mxu0  ;;  %v1141_v63 = vpop.f32.mrb[36].mxu1 }
 0x249   : > { %v1218_v0 = vmax.f32 %v1028_v62, 0.0  ;;  %v1220_v1 = vmax.f32 %v1141_v63, 0.0  ;;  %v1030_v2 = vpop.f32.mrb[37].mxu0  ;;  %v1143_v3 = vpop.f32.mrb[37].mxu1 }
 0x24a   : > { %v1219_v4 = vmax.f32 %v1030_v2, 0.0  ;;  %v1221_v5 = vmax.f32 %v1143_v3, 0.0  ;;  %v1032_v6 = vpop.f32.mrb[38].mxu0  ;;  %v1145_v7 = vpop.f32.mrb[38].mxu1 }
 0x24b   : > { %v1222_v8 = vmax.f32 %v1032_v6, 0.0  ;;  %v1224_v9 = vmax.f32 %v1145_v7, 0.0  ;;  %v1034_v10 = vpop.f32.mrb[39].mxu0  ;;  %v1147_v11 = vpop.f32.mrb[39].mxu1 }
 0x24c   : > { %v1727_v12 = vpack.c.bf16 %v1219_v4, %v1218_v0  ;;  %v1728_v13 = vpack.c.bf16 %v1221_v5, %v1220_v1  ;;  %v1223_v14 = vmax.f32 %v1034_v10, 0.0  ;;  %v1225_v15 = vmax.f32 %v1147_v11, 0.0 }
 0x24e   : > { %1470 = vst [vmem:[%s2499_s20 + $0x20] sm:$0xff] %v1727_v12  ;;  %1471 = vst [vmem:[%s2499_s20 + $0x28] sm:$0xff] %v1728_v13  ;;  %v1729_v16 = vpack.c.bf16 %v1223_v14, %v1222_v8  ;;  %v1730_v17 = vpack.c.bf16 %v1225_v15, %v1224_v9 }
 0x250   : > { %1472 = vst [vmem:[%s2499_s20 + $0x30] sm:$0xff] %v1729_v16  ;;  %1473 = vst [vmem:[%s2499_s20 + $0x38] sm:$0xff] %v1730_v17  ;;  %v1038_v18 = vpop.f32.mrb[40].mxu0  ;;  %v1151_v19 = vpop.f32.mrb[40].mxu1 }
 0x251   : > { %v1226_v20 = vmax.f32 %v1038_v18, 0.0  ;;  %v1228_v21 = vmax.f32 %v1151_v19, 0.0  ;;  %v1040_v22 = vpop.f32.mrb[41].mxu0  ;;  %v1153_v23 = vpop.f32.mrb[41].mxu1 }
 0x252   : > { %v1227_v24 = vmax.f32 %v1040_v22, 0.0  ;;  %v1229_v25 = vmax.f32 %v1153_v23, 0.0  ;;  %v1042_v26 = vpop.f32.mrb[42].mxu0  ;;  %v1155_v27 = vpop.f32.mrb[42].mxu1 }
 0x253   : > { %v1230_v28 = vmax.f32 %v1042_v26, 0.0  ;;  %v1232_v29 = vmax.f32 %v1155_v27, 0.0  ;;  %v1044_v30 = vpop.f32.mrb[43].mxu0  ;;  %v1157_v31 = vpop.f32.mrb[43].mxu1 }
 0x254   : > { %v1731_v33 = vpack.c.bf16 %v1227_v24, %v1226_v20  ;;  %v1732_v34 = vpack.c.bf16 %v1229_v25, %v1228_v21  ;;  %v1231_v35 = vmax.f32 %v1044_v30, 0.0  ;;  %v1233_v36 = vmax.f32 %v1157_v31, 0.0 }
 0x256   : > { %1474 = vst [vmem:[%s2499_s20 + $0x40] sm:$0xff] %v1731_v33  ;;  %1475 = vst [vmem:[%s2499_s20 + $0x48] sm:$0xff] %v1732_v34  ;;  %v1733_v37 = vpack.c.bf16 %v1231_v35, %v1230_v28  ;;  %v1734_v38 = vpack.c.bf16 %v1233_v36, %v1232_v29 }
 0x258   : > { %1476 = vst [vmem:[%s2499_s20 + $0x50] sm:$0xff] %v1733_v37  ;;  %1477 = vst [vmem:[%s2499_s20 + $0x58] sm:$0xff] %v1734_v38  ;;  %v1048_v39 = vpop.f32.mrb[44].mxu0  ;;  %v1161_v40 = vpop.f32.mrb[44].mxu1 }
 0x259   : > { %v1234_v41 = vmax.f32 %v1048_v39, 0.0  ;;  %v1236_v42 = vmax.f32 %v1161_v40, 0.0  ;;  %v1050_v43 = vpop.f32.mrb[45].mxu0  ;;  %v1163_v44 = vpop.f32.mrb[45].mxu1 }
 0x25a   : > { %v1235_v45 = vmax.f32 %v1050_v43, 0.0  ;;  %v1237_v46 = vmax.f32 %v1163_v44, 0.0  ;;  %v1052_v47 = vpop.f32.mrb[46].mxu0  ;;  %v1165_v48 = vpop.f32.mrb[46].mxu1 }
 0x25b   : > { %v1238_v49 = vmax.f32 %v1052_v47, 0.0  ;;  %v1240_v50 = vmax.f32 %v1165_v48, 0.0  ;;  %v1054_v51 = vpop.f32.mrb[47].mxu0  ;;  %v1167_v52 = vpop.f32.mrb[47].mxu1 }
 0x25c   : > { %v1735_v53 = vpack.c.bf16 %v1235_v45, %v1234_v41  ;;  %v1736_v54 = vpack.c.bf16 %v1237_v46, %v1236_v42  ;;  %v1239_v32 = vmax.f32 %v1054_v51, 0.0  ;;  %v1241_v55 = vmax.f32 %v1167_v52, 0.0 }
 0x25e   : > { %1478 = vst [vmem:[%s2499_s20 + $0x60] sm:$0xff] %v1735_v53  ;;  %1479 = vst [vmem:[%s2499_s20 + $0x68] sm:$0xff] %v1736_v54  ;;  %v1737_v56 = vpack.c.bf16 %v1239_v32, %v1238_v49  ;;  %v1738_v57 = vpack.c.bf16 %v1241_v55, %v1240_v50 }
 0x260   : > { %1480 = vst [vmem:[%s2499_s20 + $0x70] sm:$0xff] %v1737_v56  ;;  %1481 = vst [vmem:[%s2499_s20 + $0x78] sm:$0xff] %v1738_v57  ;;  %v1058_v58 = vpop.f32.mrb[48].mxu0  ;;  %v1171_v59 = vpop.f32.mrb[48].mxu1 }
 0x261   : > { %v1242_v60 = vmax.f32 %v1058_v58, 0.0  ;;  %v1244_v61 = vmax.f32 %v1171_v59, 0.0  ;;  %v1060_v62 = vpop.f32.mrb[49].mxu0  ;;  %v1173_v63 = vpop.f32.mrb[49].mxu1 }
 0x262   : > { %v1243_v0 = vmax.f32 %v1060_v62, 0.0  ;;  %v1245_v1 = vmax.f32 %v1173_v63, 0.0  ;;  %v1062_v2 = vpop.f32.mrb[50].mxu0  ;;  %v1175_v3 = vpop.f32.mrb[50].mxu1 }
 0x263   : > { %v1246_v4 = vmax.f32 %v1062_v2, 0.0  ;;  %v1248_v5 = vmax.f32 %v1175_v3, 0.0  ;;  %v1064_v6 = vpop.f32.mrb[51].mxu0  ;;  %v1177_v7 = vpop.f32.mrb[51].mxu1 }
 0x264   : > { %v1739_v8 = vpack.c.bf16 %v1243_v0, %v1242_v60  ;;  %v1740_v9 = vpack.c.bf16 %v1245_v1, %v1244_v61  ;;  %v1247_v10 = vmax.f32 %v1064_v6, 0.0  ;;  %v1249_v11 = vmax.f32 %v1177_v7, 0.0 }
 0x266   : > { %1482 = vst [vmem:[%s2499_s20 + $0x80] sm:$0xff] %v1739_v8  ;;  %1483 = vst [vmem:[%s2499_s20 + $0x88] sm:$0xff] %v1740_v9  ;;  %v1741_v12 = vpack.c.bf16 %v1247_v10, %v1246_v4  ;;  %v1742_v13 = vpack.c.bf16 %v1249_v11, %v1248_v5 }
 0x268   : > { %1484 = vst [vmem:[%s2499_s20 + $0x90] sm:$0xff] %v1741_v12  ;;  %1485 = vst [vmem:[%s2499_s20 + $0x98] sm:$0xff] %v1742_v13  ;;  %v1068_v14 = vpop.f32.mrb[52].mxu0  ;;  %v1181_v15 = vpop.f32.mrb[52].mxu1 }
 0x269   : > { %v1250_v16 = vmax.f32 %v1068_v14, 0.0  ;;  %v1252_v17 = vmax.f32 %v1181_v15, 0.0  ;;  %v1070_v18 = vpop.f32.mrb[53].mxu0  ;;  %v1183_v19 = vpop.f32.mrb[53].mxu1 }
 0x26a   : > { %v1251_v20 = vmax.f32 %v1070_v18, 0.0  ;;  %v1253_v21 = vmax.f32 %v1183_v19, 0.0  ;;  %v1072_v22 = vpop.f32.mrb[54].mxu0  ;;  %v1185_v23 = vpop.f32.mrb[54].mxu1 }
 0x26b   : > { %v1254_v24 = vmax.f32 %v1072_v22, 0.0  ;;  %v1256_v25 = vmax.f32 %v1185_v23, 0.0  ;;  %v1074_v26 = vpop.f32.mrb[55].mxu0  ;;  %v1187_v27 = vpop.f32.mrb[55].mxu1 }
 0x26c   : > { %v1743_v28 = vpack.c.bf16 %v1251_v20, %v1250_v16  ;;  %v1744_v29 = vpack.c.bf16 %v1253_v21, %v1252_v17  ;;  %v1255_v30 = vmax.f32 %v1074_v26, 0.0  ;;  %v1257_v31 = vmax.f32 %v1187_v27, 0.0 }
 0x26e   : > { %1486 = vst [vmem:[%s2499_s20 + $0xa0] sm:$0xff] %v1743_v28  ;;  %1487 = vst [vmem:[%s2499_s20 + $0xa8] sm:$0xff] %v1744_v29  ;;  %v1745_v33 = vpack.c.bf16 %v1255_v30, %v1254_v24  ;;  %v1746_v34 = vpack.c.bf16 %v1257_v31, %v1256_v25 }
 0x270   : > { %1488 = vst [vmem:[%s2499_s20 + $0xb0] sm:$0xff] %v1745_v33  ;;  %1489 = vst [vmem:[%s2499_s20 + $0xb8] sm:$0xff] %v1746_v34  ;;  %v1078_v35 = vpop.f32.mrb[56].mxu0  ;;  %v1191_v36 = vpop.f32.mrb[56].mxu1 }
 0x271   : > { %v1258_v37 = vmax.f32 %v1078_v35, 0.0  ;;  %v1260_v38 = vmax.f32 %v1191_v36, 0.0  ;;  %v1080_v39 = vpop.f32.mrb[57].mxu0  ;;  %v1193_v40 = vpop.f32.mrb[57].mxu1 }
 0x272   : > { %v1259_v41 = vmax.f32 %v1080_v39, 0.0  ;;  %v1261_v42 = vmax.f32 %v1193_v40, 0.0  ;;  %v1082_v43 = vpop.f32.mrb[58].mxu0  ;;  %v1195_v44 = vpop.f32.mrb[58].mxu1 }
 0x273   : > { %v1262_v45 = vmax.f32 %v1082_v43, 0.0  ;;  %v1264_v46 = vmax.f32 %v1195_v44, 0.0  ;;  %v1084_v47 = vpop.f32.mrb[59].mxu0  ;;  %v1197_v48 = vpop.f32.mrb[59].mxu1 }
 0x274   : > { %v1747_v49 = vpack.c.bf16 %v1259_v41, %v1258_v37  ;;  %v1748_v50 = vpack.c.bf16 %v1261_v42, %v1260_v38  ;;  %v1263_v51 = vmax.f32 %v1084_v47, 0.0  ;;  %v1265_v52 = vmax.f32 %v1197_v48, 0.0 }
 0x276   : > { %1490 = vst [vmem:[%s2499_s20 + $0xc0] sm:$0xff] %v1747_v49  ;;  %1491 = vst [vmem:[%s2499_s20 + $0xc8] sm:$0xff] %v1748_v50  ;;  %v1749_v53 = vpack.c.bf16 %v1263_v51, %v1262_v45  ;;  %v1750_v54 = vpack.c.bf16 %v1265_v52, %v1264_v46 }
 0x278   : > { %1492 = vst [vmem:[%s2499_s20 + $0xd0] sm:$0xff] %v1749_v53  ;;  %1493 = vst [vmem:[%s2499_s20 + $0xd8] sm:$0xff] %v1750_v54  ;;  %v1088_v32 = vpop.f32.mrb[60].mxu0  ;;  %v1201_v55 = vpop.f32.mrb[60].mxu1 }
 0x279   : > { %v1266_v56 = vmax.f32 %v1088_v32, 0.0  ;;  %v1268_v57 = vmax.f32 %v1201_v55, 0.0  ;;  %v1090_v58 = vpop.f32.mrb[61].mxu0  ;;  %v1203_v59 = vpop.f32.mrb[61].mxu1 }
 0x27a   : > { %v1267_v60 = vmax.f32 %v1090_v58, 0.0  ;;  %v1269_v61 = vmax.f32 %v1203_v59, 0.0  ;;  %v1092_v62 = vpop.f32.mrb[62].mxu0  ;;  %v1205_v63 = vpop.f32.mrb[62].mxu1 }
 0x27b   : > { %v1270_v0 = vmax.f32 %v1092_v62, 0.0  ;;  %v1272_v1 = vmax.f32 %v1205_v63, 0.0  ;;  %v1094_v2 = vpop.f32.mrb[63].mxu0  ;;  %v1207_v3 = vpop.f32.mrb[63].mxu1 }
 0x27c   : > { %v1751_v4 = vpack.c.bf16 %v1267_v60, %v1266_v56  ;;  %v1752_v5 = vpack.c.bf16 %v1269_v61, %v1268_v57  ;;  %v1271_v6 = vmax.f32 %v1094_v2, 0.0  ;;  %v1273_v7 = vmax.f32 %v1207_v3, 0.0 }
 0x27e   : > { %1494 = vst [vmem:[%s2499_s20 + $0xe0] sm:$0xff] %v1751_v4  ;;  %1495 = vst [vmem:[%s2499_s20 + $0xe8] sm:$0xff] %v1752_v5  ;;  %v1753_v8 = vpack.c.bf16 %v1271_v6, %v1270_v0  ;;  %v1754_v9 = vpack.c.bf16 %v1273_v7, %v1272_v1 }
 0x280   : > { %1496 = vst [vmem:[%s2499_s20 + $0xf0] sm:$0xff] %v1753_v8  ;;  %1497 = vst [vmem:[%s2499_s20 + $0xf8] sm:$0xff] %v1754_v9 }
 0x281   : > { %2140 = shalt.err (!%p2137_p2)
}
 0x282   : > { %s2141_s17 = scalar_lea.hbm %s2534_s7, 4096  ;;  %s2145_s30 = scalar_lea.hbm %s2587_s3, 8192 }
 0x283   : > { %p2142_p13 = scmp.ne.s32.totalorder %s2534_s7, %s2141_s17  ;;  %p2146_p4 = scmp.lt.u32.totalorder %s2534_s7, %s2587_s3 }
 0x284   : > { %p2147_p7 = scmp.lt.u32.totalorder %s2145_s30, %s2141_s17  ;;  %p2149_p11 = scmp.lt.u32.totalorder %s2141_s17, %s2534_s7 }
 0x285   : > { %p2143_p6 = pnand %p2142_p13, %p2601_p0 }
 0x286   : > { %p2148_p8 = por %p2147_p7, %p2146_p4 }
 0x287   : > { %p2144_p10 = pneg %p2143_p6 }
 0x288   : > { %p2150_p1 = por %p2149_p11, %p2148_p8 }
 0x28a   : > { %p2151_p3 = pnand %p2150_p1, %p2144_p10 }
 0x28c   : > { %2154 = shalt.err (!%p2151_p3)
}
 0x28d   : > { %s2210_s18 = smov 256   ;;  %s2211_s20 = smov 16  }
 0x28e   : > { %1895 = dma.vmem_to_hbm [thread:$0]  (%p2601_p0), %s2536_s27, 4096, %s2534_s7, %s1499_s16, %s2210_s18, %s2210_s18, %s2211_s20  }
 0x28f PF: > { %s1528_s24 = sand.u32 1, %s2185_s12   ;;  %p2602_p5 = scmp.ne.s32.totalorder %s2592_s19, 0 }
 0x290   : > { %p2603_p9 = scmp.ge.s32.totalorder %s2197_s15, 2  ;;  %s1529_s28 = scalar_lea.sflag [#allocation4], %s1528_s24 }
 0x292   : > { %p1909_p12 = pnand %p2603_p9, %p2602_p5 }
 0x294   : > { %2180 = dma.done.wait (!%p1909_p12), %s1529_s28, 4096  }
 0x295   : > { %2182 = vsyncadd (!%p1909_p12), %s1529_s28, 4294963200  ;;  %p17_p2 = scmp.ge.s32.totalorder %s2342_s6, 4   ;;  %s2604_s12 = smov %s2189_s13 }
 0x296   : > { %s2605_s13 = smov %s2193_s14  ;;  %s2606_s14 = smov %s2351_s9 }
 0x297   : > { %s2607_s15 = smov %s2342_s6  ;;  %19 = sbr.rel (!%p17_p2) target bundleno = 6 (0x6), region = 85 }
 0x29e   :  { %1534 = vsyncpa [#allocation3], 1 }
 0x29f   :  { %1536 = vsyncpa [#allocation3 + $0x1], 1 }
 0x2a0   :  { %1537 = vsyncpa [#allocation6], 1 }
 0x2a1   :  { %1538 = vsyncpa [#allocation4], 1 }
 0x2a2   :  { %1540 = vsyncpa [#allocation4 + $0x1], 1 }

</bundles_post_ra>
